<compile_context>
chip_gen: v6e
topology: v6e:2x2x1
jax: 0.10.0
libtpu: 0.0.40
codegen_flags: <defaults>
</compile_context>

<pallas_src>
import functools
import math

import jax
import jax.numpy as jnp
from jax import lax
from jax.experimental import pallas as pl
from jax.experimental.pallas import tpu as pltpu

_BN_EPS = 1e-5
_INV_SQRT2 = 1.0 / math.sqrt(2.0)
_LANE = 128
# ~0.35 us per grid step at ~1.3 TB/s HBM  ->  ~450 KB of "equivalent traffic".
_STEP_OVERHEAD_BYTES = 450_000


def _round_up(a, b):
    return -(-a // b) * b


def _vmem_caps():
    """Generation-aware (tile_budget_bytes, vmem_limit_bytes)."""
    try:
        cap = int(getattr(pltpu.get_tpu_info(), "vmem_capacity_bytes", 64 << 20))
    except Exception:  # pragma: no cover - be conservative if query unavailable
        cap = 64 << 20
    if cap >= (128 << 20):          # v5e / v6e: use far more than the old 24 MiB
        return 80 << 20, 100 << 20
    # v7x (64 MiB physical): leave headroom for Mosaic internal scratch.
    return 26 << 20, 50 << 20


def _working_set(b, t, cin, cout):
    """Conservative per-step VMEM bytes: double-buffered x / h tiles, weights,
    and in-kernel f32 temporaries (x load, y, z, erf intermediates)."""
    io = 2 * 4 * b * t * (cin + cout)              # pipelined input + output buffers
    tmp = 4 * b * t * (cin + 4 * cout)             # y/z/gelu temporaries
    wts = 8 * cin * cout + 4 * cout * (cout + 4)   # weights (x2) + scale/shift/gram
    return io + tmp + wts + (1 << 20)


def _plan(n, l, dims, budget):
    """Pick a shared lane tile, the padded length and per-layer batch blocks.

    dims: [(cin, cout), ...] per layer.  Returns (l_pad, tile_l, [b_blk, ...]).
    """
    l128 = _round_up(l, _LANE)
    n_divs = sorted({d for d in range(1, min(n, 8) + 1) if n % d == 0},
                    reverse=True)
    best = None
    for t in (16384, 8192, 4096, 2048, 1024, 512):
        t_eff = min(t, l128)                        # full extent when L is small
        l_pad = _round_up(l128, t_eff)              # never a ragged / 128-wide tail
        n_lt = l_pad // t_eff
        bs, cost, ok = [], 0.0, True
        for idx, (ci, co) in enumerate(dims):
            b = next((d for d in n_divs
                      if _working_set(d, t_eff, ci, co) <= budget), None)
            if b is None:
                ok = False
                break
            bs.append(b)
            passes = 2 if idx == 0 else 1           # later layers fuse their stats
            words = (2 if idx == 0 else 1) * ci + co
            cost += 4.0 * n * l_pad * words
            cost += passes * (n // b) * n_lt * _STEP_OVERHEAD_BYTES
        if not ok:
            continue
        if best is None or cost < best[0]:
            best = (cost, l_pad, t_eff, bs)
    if best is None:                                 # absurdly wide layers: 1 tile
        return l128, l128, [1] * len(dims)
    return best[1], best[2], best[3]


# ---------------------------------------------------------------------------
# Kernels
# ---------------------------------------------------------------------------
def _stats_kernel(x_ref, w_ref, sum_ref, sq_ref):
    """First-layer pass 1: per-channel sum / sum-of-squares of y = W @ x,
    accumulated over the L-tile grid axis (axis 1, 'arbitrary')."""
    @pl.when(pl.program_id(1) == 0)
    def _init():
        sum_ref[...] = jnp.zeros_like(sum_ref)
        sq_ref[...] = jnp.zeros_like(sq_ref)

    w = w_ref[...]                                        # (Cout, Cin)
    s = jnp.zeros(sum_ref.shape[1:], jnp.float32)         # (Cout, 1)
    q = jnp.zeros_like(s)
    for b in range(x_ref.shape[0]):                       # small, unrolled
        y = jnp.dot(w, x_ref[b], preferred_element_type=jnp.float32)
        s = s + jnp.sum(y, axis=1, keepdims=True)
        q = q + jnp.sum(y * y, axis=1, keepdims=True)
    sum_ref[0] += s
    sq_ref[0] += q


def _apply_kernel(x_ref, w_ref, scale_ref, shift_ref, o_ref, *rest,
                  l_true, tile_l, mask_tail, fuse_stats):
    """Pass 2: y = W @ x, folded BN affine, exact GELU.  Optionally also
    accumulates sum_l(h) and the Gram matrix G = sum_l h h^T so the NEXT
    layer's batch statistics need no extra pass over HBM."""
    if fuse_stats:
        hsum_ref, gram_ref = rest

        @pl.when(pl.program_id(1) == 0)
        def _init():
            hsum_ref[...] = jnp.zeros_like(hsum_ref)
            gram_ref[...] = jnp.zeros_like(gram_ref)

        hs = jnp.zeros(hsum_ref.shape[1:], jnp.float32)   # (Cout, 1)
        gr = jnp.zeros(gram_ref.shape[1:], jnp.float32)   # (Cout, Cout)

    w = w_ref[...]
    scale = scale_ref[...]
    shift = shift_ref[...]
    if mask_tail:
        lane = (pl.program_id(1) * tile_l
                + lax.broadcasted_iota(jnp.int32, (1, tile_l), 1))
        valid = (lane < l_true).astype(jnp.float32)       # keep padded lanes == 0

    for b in range(x_ref.shape[0]):                       # small, unrolled
        y = jnp.dot(w, x_ref[b], preferred_element_type=jnp.float32)
        z = scale * y + shift
        h = 0.5 * z * (1.0 + lax.erf(z * _INV_SQRT2))     # exact GELU
        if mask_tail:
            h = h * valid
        o_ref[b] = h.astype(o_ref.dtype)
        if fuse_stats:
            hs = hs + jnp.sum(h, axis=1, keepdims=True)
            gr = gr + lax.dot_general(h, h, (((1,), (1,)), ((), ())),
                                      preferred_element_type=jnp.float32)
    if fuse_stats:
        hsum_ref[0] += hs
        gram_ref[0] += gr


# ---------------------------------------------------------------------------
# Per-layer pallas_call wrappers
# ---------------------------------------------------------------------------
def _stats_pass(x, w, b_blk, tile_l, vmem_limit):
    n, cin, l_pad = x.shape
    cout = w.shape[0]
    n_lt = l_pad // tile_l
    # TODO(synk): on v7x with n // b_blk == 1, a 2-way 'parallel' split of the
    # L axis (per-core partial accumulators) would keep both TensorCores busy.
    sums, sqs = pl.pallas_call(
        _stats_kernel,
        out_shape=(jax.ShapeDtypeStruct((n // b_blk, cout, 1), jnp.float32),
                   jax.ShapeDtypeStruct((n // b_blk, cout, 1), jnp.float32)),
        grid=(n // b_blk, n_lt),
        in_specs=[
            pl.BlockSpec((b_blk, cin, tile_l), lambda i, j: (i, 0, j)),
            pl.BlockSpec((cout, cin), lambda i, j: (0, 0)),
        ],
        out_specs=(
            pl.BlockSpec((1, cout, 1), lambda i, j: (i, 0, 0)),
            pl.BlockSpec((1, cout, 1), lambda i, j: (i, 0, 0)),
        ),
        compiler_params=pltpu.CompilerParams(
            dimension_semantics=("parallel", "arbitrary"),
            vmem_limit_bytes=vmem_limit),
    )(x, w)
    return jnp.sum(sums[:, :, 0], axis=0), jnp.sum(sqs[:, :, 0], axis=0)


def _apply_pass(x, w, scale, shift, b_blk, tile_l, l_true, vmem_limit,
                fuse_stats):
    n, cin, l_pad = x.shape
    cout = w.shape[0]
    n_lt = l_pad // tile_l
    mask_tail = fuse_stats and (l_pad != l_true)   # next layer needs zero pad lanes
    kern = functools.partial(_apply_kernel, l_true=l_true, tile_l=tile_l,
                             mask_tail=mask_tail, fuse_stats=fuse_stats)

    out_shape = [jax.ShapeDtypeStruct((n, cout, l_pad), jnp.float32)]
    out_specs = [pl.BlockSpec((b_blk, cout, tile_l), lambda i, j: (i, 0, j))]
    if fuse_stats:
        out_shape += [
            jax.ShapeDtypeStruct((n // b_blk, cout, 1), jnp.float32),
            jax.ShapeDtypeStruct((n // b_blk, cout, cout), jnp.float32),
        ]
        out_specs += [
            pl.BlockSpec((1, cout, 1), lambda i, j: (i, 0, 0)),
            pl.BlockSpec((1, cout, cout), lambda i, j: (i, 0, 0)),
        ]
        sem = ("parallel", "arbitrary")            # accumulate over L tiles
    else:
        sem = ("parallel", "parallel")             # fully independent tiles

    outs = pl.pallas_call(
        kern,
        out_shape=tuple(out_shape),
        grid=(n // b_blk, n_lt),
        in_specs=[
            pl.BlockSpec((b_blk, cin, tile_l), lambda i, j: (i, 0, j)),
            pl.BlockSpec((cout, cin), lambda i, j: (0, 0)),
            pl.BlockSpec((cout, 1), lambda i, j: (0, 0)),
            pl.BlockSpec((cout, 1), lambda i, j: (0, 0)),
        ],
        out_specs=tuple(out_specs),
        compiler_params=pltpu.CompilerParams(
            dimension_semantics=sem,
            vmem_limit_bytes=vmem_limit),
    )(x, w, scale, shift)

    if fuse_stats:
        h, hsum, gram = outs
        return h, jnp.sum(hsum[:, :, 0], axis=0), jnp.sum(gram, axis=0)
    (h,) = outs
    return h, None, None


def _bn_affine(sums, sqs, count, gamma, beta):
    mean = sums / count
    # TODO(synk): E[y^2]-E[y]^2 can cancel for |mean| >> std; a shifted
    # (per-channel pivot) accumulation would be more robust on ill-conditioned
    # data.
    var = jnp.maximum(sqs / count - mean * mean, 0.0)
    scale = gamma * lax.rsqrt(var + _BN_EPS)
    shift = beta - scale * mean
    return scale.reshape(-1, 1), shift.reshape(-1, 1)


# ---------------------------------------------------------------------------
# Module-level forward
# ---------------------------------------------------------------------------
def init_conv_block_params(key, in_c, out_c, layer=1):
    """Mirror conv_block.__init__ channel plan; deterministic init."""
    if layer == 2:
        dims = [out_c // 2, out_c] if in_c < out_c else [in_c // 2, out_c]
    else:
        dims = [out_c]

    params = []
    d_in = in_c
    for d_out in dims:
        key, kw, kb = jax.random.split(key, 3)
        bound = 1.0 / math.sqrt(d_in)  # Conv1d(k=1) default-ish init
        w = jax.random.uniform(kw, (d_out, d_in), jnp.float32, -bound, bound)
        b = jax.random.uniform(kb, (d_out,), jnp.float32, -bound, bound)
        params.append(dict(w=w, b=b,
                           gamma=jnp.ones((d_out,), jnp.float32),
                           beta=jnp.zeros((d_out,), jnp.float32)))
        d_in = d_out
    return params


@jax.jit
def conv_block_forward(x, params):
    """x: (N, C_in, L) float32, NCL layout like PyTorch Conv1d.

    The Conv1d bias `b` is kept in params for init fidelity but is NOT
    applied: under training-mode BatchNorm1d a per-channel bias cancels
    exactly in (y - mean) and leaves the variance unchanged.
    """
    # TODO(synk): Dropout with p > 0 would need in-kernel PRNG (pltpu.prng_*);
    # the module is exercised with p == 0 (identity) here.
    # TODO(synk): BatchNorm running_mean / running_var buffers are not updated
    # (forward output only).
    n, _, l = x.shape
    dims = [(p["w"].shape[1], p["w"].shape[0]) for p in params]
    budget, vmem_limit = _vmem_caps()
    l_pad, tile_l, b_blks = _plan(n, l, dims, budget)

    # Pad once for the whole block; padded layout is carried across layers.
    h = jnp.pad(x, ((0, 0), (0, 0), (0, l_pad - l))) if l_pad != l else x
    count = jnp.float32(n * l)           # padded lanes contribute exactly zero

    sums = sqs = None
    for i, (p, b_blk) in enumerate(zip(params, b_blks)):
        w = p["w"]
        if sums is None:                 # first layer: explicit stats pass
            sums, sqs = _stats_pass(h, w, b_blk, tile_l, vmem_limit)
        scale, shift = _bn_affine(sums, sqs, count, p["gamma"], p["beta"])

        fuse = i + 1 < len(params)       # fuse the NEXT layer's stats pass
        h, hsum, gram = _apply_pass(h, w, scale, shift, b_blk, tile_l, l,
                                    vmem_limit, fuse)
        if fuse:
            w_next = params[i + 1]["w"]
            sums = w_next @ hsum                              # (C_next,)
            sqs = jnp.sum((w_next @ gram) * w_next, axis=1)   # (C_next,)
        else:
            sums = sqs = None

    return h[:, :, :l] if l_pad != l else h


# ---------------------------------------------------------------------------
# Pure-jnp reference (matches the PyTorch module, training-mode BN)
# ---------------------------------------------------------------------------
def _reference(x, params):
    h = x
    for p in params:
        y = jnp.einsum("oc,ncl->nol", p["w"], h) + p["b"][None, :, None]
        mean = jnp.mean(y, axis=(0, 2), keepdims=True)
        var = jnp.mean((y - mean) ** 2, axis=(0, 2), keepdims=True)
        z = (p["gamma"][None, :, None] * (y - mean) * lax.rsqrt(var + _BN_EPS)
             + p["beta"][None, :, None])
        h = 0.5 * z * (1.0 + lax.erf(z * _INV_SQRT2))
    return h


if __name__ == "__main__":
    key = jax.random.PRNGKey(0)
    k_x, k_p1, k_p2 = jax.random.split(key, 3)

    N, C_in, C_out, L = 2, 4, 8, 16
    x = jax.random.normal(k_x, (N, C_in, L), dtype=jnp.float32)

    # layer=1 exercises the stats + plain-apply path;
    # layer=2 exercises the fused Gram-stats path and padded-lane masking.
    for layer, k_p in ((1, k_p1), (2, k_p2)):
        params = init_conv_block_params(k_p, C_in, C_out, layer=layer)
        out = conv_block_forward(x, params)
        jax.block_until_ready(out)
        assert out.shape == (N, C_out, L), (layer, out.shape)

        ref = _reference(x, params)
        max_err = float(jnp.max(jnp.abs(out - ref)))
        assert jnp.allclose(out, ref, atol=1e-4, rtol=1e-4), (layer, max_err)

    print("KERNEL_OK")
</pallas_src>

<mosaic_0001>
module attributes {stable_mosaic.version = 11 : i64} {
  func.func @_stats_kernel(%arg0: i32, %arg1: i32, %arg2: memref<2x4x128xf32, #tpu.memory_space<vmem>>, %arg3: memref<8x4xf32, #tpu.memory_space<vmem>>, %arg4: memref<1x8x1xf32, #tpu.memory_space<vmem>>, %arg5: memref<1x8x1xf32, #tpu.memory_space<vmem>>) attributes {dimension_semantics = [#tpu.dimension_semantics<parallel>, #tpu.dimension_semantics<arbitrary>], iteration_bounds = array<i64: 1, 1>, scalar_prefetch = 0 : i64, scratch_operands = 0 : i64, tpu.core_type = #tpu.core_type<tc>, window_params = [{transform_indices = @transform_0, window_bounds = array<i64: 2, 4, 128>}, {pipeline_mode = #tpu.pipeline_mode<synchronous>, transform_indices = @transform_1, window_bounds = array<i64: 8, 4>}, {transform_indices = @transform_2, window_bounds = array<i64: 1, 8, 1>}, {transform_indices = @transform_3, window_bounds = array<i64: 1, 8, 1>}]} {
    %c0_i32 = arith.constant 0 : i32
    %0 = arith.cmpi eq, %arg1, %c0_i32 : i32
    %1 = arith.extui %0 : i1 to i32
    %c0_i32_0 = arith.constant 0 : i32
    %2 = arith.cmpi ne, %1, %c0_i32_0 : i32
    scf.if %2 {
      %cst_26 = arith.constant 0.000000e+00 : f32
      %38 = vector.broadcast %cst_26 : f32 to vector<1x8x1xf32>
      %c0_27 = arith.constant 0 : index
      %c0_28 = arith.constant 0 : index
      %c0_29 = arith.constant 0 : index
      %39 = vector.load %arg4[%c0_27, %c0_28, %c0_29] : memref<1x8x1xf32, #tpu.memory_space<vmem>>, vector<1x8x1xf32>
      tpu.vector_store %arg4[%c0_27, %c0_28, %c0_29], %38 {strides = array<i32>} : memref<1x8x1xf32, #tpu.memory_space<vmem>>, vector<1x8x1xf32>,
      %cst_30 = arith.constant 0.000000e+00 : f32
      %40 = vector.broadcast %cst_30 : f32 to vector<1x8x1xf32>
      %c0_31 = arith.constant 0 : index
      %c0_32 = arith.constant 0 : index
      %c0_33 = arith.constant 0 : index
      %41 = vector.load %arg5[%c0_31, %c0_32, %c0_33] : memref<1x8x1xf32, #tpu.memory_space<vmem>>, vector<1x8x1xf32>
      tpu.vector_store %arg5[%c0_31, %c0_32, %c0_33], %40 {strides = array<i32>} : memref<1x8x1xf32, #tpu.memory_space<vmem>>, vector<1x8x1xf32>,
    } else {
    }
    %c0 = arith.constant 0 : index
    %c0_1 = arith.constant 0 : index
    %3 = vector.load %arg3[%c0, %c0_1] : memref<8x4xf32, #tpu.memory_space<vmem>>, vector<8x4xf32>
    %cst = arith.constant 0.000000e+00 : f32
    %4 = vector.broadcast %cst : f32 to vector<8x1xf32>
    %cst_2 = arith.constant 0.000000e+00 : f32
    %5 = vector.broadcast %cst_2 : f32 to vector<8x1xf32>
    %c0_3 = arith.constant 0 : index
    %c0_4 = arith.constant 0 : index
    %c0_5 = arith.constant 0 : index
    %6 = vector.load %arg2[%c0_3, %c0_4, %c0_5] : memref<2x4x128xf32, #tpu.memory_space<vmem>>, vector<1x4x128xf32>
    %7 = vector.shape_cast %6 : vector<1x4x128xf32> to vector<4x128xf32>
    %cst_6 = arith.constant dense<0.000000e+00> : vector<8x128xf32>
    %8 = tpu.matmul %3, %7, %cst_6 {dimension_numbers = #tpu.dot_dimension_numbers<[1], [0], [0], [1], [0, 0, 1, 1], [], []>} : vector<8x4xf32>, vector<4x128xf32>, vector<8x128xf32> -> vector<8x128xf32>
    %cst_7 = arith.constant dense<0.000000e+00> : vector<8xf32>
    %9 = vector.multi_reduction <add>, %8, %cst_7 [1] : vector<8x128xf32> to vector<8xf32>
    %10 = vector.shape_cast %9 : vector<8xf32> to vector<8x1xf32>
    %11 = arith.addf %4, %10 : vector<8x1xf32>
    %12 = arith.mulf %8, %8 : vector<8x128xf32>
    %cst_8 = arith.constant dense<0.000000e+00> : vector<8xf32>
    %13 = vector.multi_reduction <add>, %12, %cst_8 [1] : vector<8x128xf32> to vector<8xf32>
    %14 = vector.shape_cast %13 : vector<8xf32> to vector<8x1xf32>
    %15 = arith.addf %5, %14 : vector<8x1xf32>
    %c1 = arith.constant 1 : index
    %c0_9 = arith.constant 0 : index
    %c0_10 = arith.constant 0 : index
    %16 = vector.load %arg2[%c1, %c0_9, %c0_10] : memref<2x4x128xf32, #tpu.memory_space<vmem>>, vector<1x4x128xf32>
    %17 = vector.shape_cast %16 : vector<1x4x128xf32> to vector<4x128xf32>
    %cst_11 = arith.constant dense<0.000000e+00> : vector<8x128xf32>
    %18 = tpu.matmul %3, %17, %cst_11 {dimension_numbers = #tpu.dot_dimension_numbers<[1], [0], [0], [1], [0, 0, 1, 1], [], []>} : vector<8x4xf32>, vector<4x128xf32>, vector<8x128xf32> -> vector<8x128xf32>
    %cst_12 = arith.constant dense<0.000000e+00> : vector<8xf32>
    %19 = vector.multi_reduction <add>, %18, %cst_12 [1] : vector<8x128xf32> to vector<8xf32>
    %20 = vector.shape_cast %19 : vector<8xf32> to vector<8x1xf32>
    %21 = arith.addf %11, %20 : vector<8x1xf32>
    %22 = arith.mulf %18, %18 : vector<8x128xf32>
    %cst_13 = arith.constant dense<0.000000e+00> : vector<8xf32>
    %23 = vector.multi_reduction <add>, %22, %cst_13 [1] : vector<8x128xf32> to vector<8xf32>
    %24 = vector.shape_cast %23 : vector<8xf32> to vector<8x1xf32>
    %25 = arith.addf %15, %24 : vector<8x1xf32>
    %c0_14 = arith.constant 0 : index
    %c0_15 = arith.constant 0 : index
    %c0_16 = arith.constant 0 : index
    %26 = vector.load %arg4[%c0_14, %c0_15, %c0_16] : memref<1x8x1xf32, #tpu.memory_space<vmem>>, vector<1x8x1xf32>
    %27 = vector.shape_cast %26 : vector<1x8x1xf32> to vector<8x1xf32>
    %28 = arith.addf %27, %21 : vector<8x1xf32>
    %c0_17 = arith.constant 0 : index
    %c0_18 = arith.constant 0 : index
    %c0_19 = arith.constant 0 : index
    %29 = vector.load %arg4[%c0_17, %c0_18, %c0_19] : memref<1x8x1xf32, #tpu.memory_space<vmem>>, vector<1x8x1xf32>
    %30 = vector.shape_cast %29 : vector<1x8x1xf32> to vector<8x1xf32>
    %31 = vector.shape_cast %28 : vector<8x1xf32> to vector<1x8x1xf32>
    tpu.vector_store %arg4[%c0_17, %c0_18, %c0_19], %31 {strides = array<i32>} : memref<1x8x1xf32, #tpu.memory_space<vmem>>, vector<1x8x1xf32>,
    %c0_20 = arith.constant 0 : index
    %c0_21 = arith.constant 0 : index
    %c0_22 = arith.constant 0 : index
    %32 = vector.load %arg5[%c0_20, %c0_21, %c0_22] : memref<1x8x1xf32, #tpu.memory_space<vmem>>, vector<1x8x1xf32>
    %33 = vector.shape_cast %32 : vector<1x8x1xf32> to vector<8x1xf32>
    %34 = arith.addf %33, %25 : vector<8x1xf32>
    %c0_23 = arith.constant 0 : index
    %c0_24 = arith.constant 0 : index
    %c0_25 = arith.constant 0 : index
    %35 = vector.load %arg5[%c0_23, %c0_24, %c0_25] : memref<1x8x1xf32, #tpu.memory_space<vmem>>, vector<1x8x1xf32>
    %36 = vector.shape_cast %35 : vector<1x8x1xf32> to vector<8x1xf32>
    %37 = vector.shape_cast %34 : vector<8x1xf32> to vector<1x8x1xf32>
    tpu.vector_store %arg5[%c0_23, %c0_24, %c0_25], %37 {strides = array<i32>} : memref<1x8x1xf32, #tpu.memory_space<vmem>>, vector<1x8x1xf32>,
    return
  }
  func.func @transform_0(%arg0: i32, %arg1: i32) -> (i32, i32, i32) {
    %c0_i32 = arith.constant 0 : i32
    %c0_i32_0 = arith.constant 0 : i32
    return %arg0, %c0_i32, %arg1 : i32, i32, i32
  }
  func.func @transform_1(%arg0: i32, %arg1: i32) -> (i32, i32) {
    %c0_i32 = arith.constant 0 : i32
    %c0_i32_0 = arith.constant 0 : i32
    %c0_i32_1 = arith.constant 0 : i32
    return %c0_i32, %c0_i32_0 : i32, i32
  }
  func.func @transform_2(%arg0: i32, %arg1: i32) -> (i32, i32, i32) {
    %c0_i32 = arith.constant 0 : i32
    %c0_i32_0 = arith.constant 0 : i32
    %c0_i32_1 = arith.constant 0 : i32
    return %arg0, %c0_i32, %c0_i32_0 : i32, i32, i32
  }
  func.func @transform_3(%arg0: i32, %arg1: i32) -> (i32, i32, i32) {
    %c0_i32 = arith.constant 0 : i32
    %c0_i32_0 = arith.constant 0 : i32
    %c0_i32_1 = arith.constant 0 : i32
    return %arg0, %c0_i32, %c0_i32_0 : i32, i32, i32
  }
}

module attributes {stable_mosaic.version = 11 : i64} {
  func.func @_apply_kernel(%arg0: i32, %arg1: i32, %arg2: memref<2x4x128xf32, #tpu.memory_space<vmem>>, %arg3: memref<8x4xf32, #tpu.memory_space<vmem>>, %arg4: memref<8x1xf32, #tpu.memory_space<vmem>>, %arg5: memref<8x1xf32, #tpu.memory_space<vmem>>, %arg6: memref<2x8x128xf32, #tpu.memory_space<vmem>>) attributes {dimension_semantics = [#tpu.dimension_semantics<parallel>, #tpu.dimension_semantics<parallel>], iteration_bounds = array<i64: 1, 1>, scalar_prefetch = 0 : i64, scratch_operands = 0 : i64, tpu.core_type = #tpu.core_type<tc>, window_params = [{transform_indices = @transform_0, window_bounds = array<i64: 2, 4, 128>}, {pipeline_mode = #tpu.pipeline_mode<synchronous>, transform_indices = @transform_1, window_bounds = array<i64: 8, 4>}, {pipeline_mode = #tpu.pipeline_mode<synchronous>, transform_indices = @transform_2, window_bounds = array<i64: 8, 1>}, {pipeline_mode = #tpu.pipeline_mode<synchronous>, transform_indices = @transform_3, window_bounds = array<i64: 8, 1>}, {transform_indices = @transform_4, window_bounds = array<i64: 2, 8, 128>}]} {
    %c0 = arith.constant 0 : index
    %c0_0 = arith.constant 0 : index
    %0 = vector.load %arg3[%c0, %c0_0] : memref<8x4xf32, #tpu.memory_space<vmem>>, vector<8x4xf32>
    %c0_1 = arith.constant 0 : index
    %c0_2 = arith.constant 0 : index
    %1 = vector.load %arg4[%c0_1, %c0_2] : memref<8x1xf32, #tpu.memory_space<vmem>>, vector<8x1xf32>
    %c0_3 = arith.constant 0 : index
    %c0_4 = arith.constant 0 : index
    %2 = vector.load %arg5[%c0_3, %c0_4] : memref<8x1xf32, #tpu.memory_space<vmem>>, vector<8x1xf32>
    %c0_5 = arith.constant 0 : index
    %c0_6 = arith.constant 0 : index
    %c0_7 = arith.constant 0 : index
    %3 = vector.load %arg2[%c0_5, %c0_6, %c0_7] : memref<2x4x128xf32, #tpu.memory_space<vmem>>, vector<1x4x128xf32>
    %4 = vector.shape_cast %3 : vector<1x4x128xf32> to vector<4x128xf32>
    %cst = arith.constant dense<0.000000e+00> : vector<8x128xf32>
    %5 = tpu.matmul %0, %4, %cst {dimension_numbers = #tpu.dot_dimension_numbers<[1], [0], [0], [1], [0, 0, 1, 1], [], []>} : vector<8x4xf32>, vector<4x128xf32>, vector<8x128xf32> -> vector<8x128xf32>
    %6 = vector.broadcast %1 : vector<8x1xf32> to vector<8x128xf32>
    %7 = arith.mulf %6, %5 : vector<8x128xf32>
    %8 = vector.broadcast %2 : vector<8x1xf32> to vector<8x128xf32>
    %9 = arith.addf %7, %8 : vector<8x128xf32>
    %cst_8 = arith.constant 5.000000e-01 : f32
    %10 = vector.broadcast %cst_8 : f32 to vector<8x128xf32>
    %11 = arith.mulf %10, %9 : vector<8x128xf32>
    %cst_9 = arith.constant 0.707106769 : f32
    %12 = vector.broadcast %cst_9 : f32 to vector<8x128xf32>
    %13 = arith.mulf %9, %12 : vector<8x128xf32>
    %14 = math.erf %13 : vector<8x128xf32>
    %cst_10 = arith.constant 1.000000e+00 : f32
    %15 = vector.broadcast %cst_10 : f32 to vector<8x128xf32>
    %16 = arith.addf %15, %14 : vector<8x128xf32>
    %17 = arith.mulf %11, %16 : vector<8x128xf32>
    %c0_11 = arith.constant 0 : index
    %c0_12 = arith.constant 0 : index
    %c0_13 = arith.constant 0 : index
    %18 = vector.load %arg6[%c0_11, %c0_12, %c0_13] : memref<2x8x128xf32, #tpu.memory_space<vmem>>, vector<1x8x128xf32>
    %19 = vector.shape_cast %18 : vector<1x8x128xf32> to vector<8x128xf32>
    %20 = vector.shape_cast %17 : vector<8x128xf32> to vector<1x8x128xf32>
    tpu.vector_store %arg6[%c0_11, %c0_12, %c0_13], %20 {strides = array<i32>} : memref<2x8x128xf32, #tpu.memory_space<vmem>>, vector<1x8x128xf32>,
    %c1 = arith.constant 1 : index
    %c0_14 = arith.constant 0 : index
    %c0_15 = arith.constant 0 : index
    %21 = vector.load %arg2[%c1, %c0_14, %c0_15] : memref<2x4x128xf32, #tpu.memory_space<vmem>>, vector<1x4x128xf32>
    %22 = vector.shape_cast %21 : vector<1x4x128xf32> to vector<4x128xf32>
    %cst_16 = arith.constant dense<0.000000e+00> : vector<8x128xf32>
    %23 = tpu.matmul %0, %22, %cst_16 {dimension_numbers = #tpu.dot_dimension_numbers<[1], [0], [0], [1], [0, 0, 1, 1], [], []>} : vector<8x4xf32>, vector<4x128xf32>, vector<8x128xf32> -> vector<8x128xf32>
    %24 = vector.broadcast %1 : vector<8x1xf32> to vector<8x128xf32>
    %25 = arith.mulf %24, %23 : vector<8x128xf32>
    %26 = vector.broadcast %2 : vector<8x1xf32> to vector<8x128xf32>
    %27 = arith.addf %25, %26 : vector<8x128xf32>
    %cst_17 = arith.constant 5.000000e-01 : f32
    %28 = vector.broadcast %cst_17 : f32 to vector<8x128xf32>
    %29 = arith.mulf %28, %27 : vector<8x128xf32>
    %cst_18 = arith.constant 0.707106769 : f32
    %30 = vector.broadcast %cst_18 : f32 to vector<8x128xf32>
    %31 = arith.mulf %27, %30 : vector<8x128xf32>
    %32 = math.erf %31 : vector<8x128xf32>
    %cst_19 = arith.constant 1.000000e+00 : f32
    %33 = vector.broadcast %cst_19 : f32 to vector<8x128xf32>
    %34 = arith.addf %33, %32 : vector<8x128xf32>
    %35 = arith.mulf %29, %34 : vector<8x128xf32>
    %c1_20 = arith.constant 1 : index
    %c0_21 = arith.constant 0 : index
    %c0_22 = arith.constant 0 : index
    %36 = vector.load %arg6[%c1_20, %c0_21, %c0_22] : memref<2x8x128xf32, #tpu.memory_space<vmem>>, vector<1x8x128xf32>
    %37 = vector.shape_cast %36 : vector<1x8x128xf32> to vector<8x128xf32>
    %38 = vector.shape_cast %35 : vector<8x128xf32> to vector<1x8x128xf32>
    tpu.vector_store %arg6[%c1_20, %c0_21, %c0_22], %38 {strides = array<i32>} : memref<2x8x128xf32, #tpu.memory_space<vmem>>, vector<1x8x128xf32>,
    return
  }
  func.func @transform_0(%arg0: i32, %arg1: i32) -> (i32, i32, i32) {
    %c0_i32 = arith.constant 0 : i32
    %c0_i32_0 = arith.constant 0 : i32
    return %arg0, %c0_i32, %arg1 : i32, i32, i32
  }
  func.func @transform_1(%arg0: i32, %arg1: i32) -> (i32, i32) {
    %c0_i32 = arith.constant 0 : i32
    %c0_i32_0 = arith.constant 0 : i32
    %c0_i32_1 = arith.constant 0 : i32
    return %c0_i32, %c0_i32_0 : i32, i32
  }
  func.func @transform_2(%arg0: i32, %arg1: i32) -> (i32, i32) {
    %c0_i32 = arith.constant 0 : i32
    %c0_i32_0 = arith.constant 0 : i32
    %c0_i32_1 = arith.constant 0 : i32
    return %c0_i32, %c0_i32_0 : i32, i32
  }
  func.func @transform_3(%arg0: i32, %arg1: i32) -> (i32, i32) {
    %c0_i32 = arith.constant 0 : i32
    %c0_i32_0 = arith.constant 0 : i32
    %c0_i32_1 = arith.constant 0 : i32
    return %c0_i32, %c0_i32_0 : i32, i32
  }
  func.func @transform_4(%arg0: i32, %arg1: i32) -> (i32, i32, i32) {
    %c0_i32 = arith.constant 0 : i32
    %c0_i32_0 = arith.constant 0 : i32
    return %arg0, %c0_i32, %arg1 : i32, i32, i32
  }
}

</mosaic_0001>

<bundles_post_ra>
// kernel: conv_block_forward.3
= control target key start
LH: loop header
LB: loop body
LE: loop exit
PB: predicated region body
PF: predicated region fallthrough
CT: control target
= control target key end

     0   :  { %vm26_vm0 = vcmask 1043456   ;;  %v270_v1 = vmov 0.0   ;;  %vm22_vm1 = vcmask 31744   ;;  %vm271_vm2 = vmmov 0   ;;  %s319_s0 = inlined_call_operand.vmem [shape: f32[2,4,128], index: 0, kind: input, shape index: {}]   ;;  %s320_s1 = inlined_call_operand.vmem [shape: f32[8,4], index: 1, kind: input, shape index: {}]   ;;  %s321_s2 = inlined_call_operand.vmem [shape: f32[8,1], index: 2, kind: input, shape index: {}]   ;;  %s322_s3 = inlined_call_operand.vmem [shape: f32[8,1], index: 3, kind: input, shape index: {}]   ;;  %s323_s4 = inlined_call_operand.hbm [shape: f32[2,8,128], index: 4, kind: output, shape index: {}]  }
   0x1   :  { %v21_v0 = vld [vmem:[%s319_s0] sm:$0xf]  ;;  %227 = vmatprep.subr.mxu0 %v270_v1  ;;  %232 = vmatprep.subr.mxu1 %v270_v1  ;;  %v220_v2 = vld [vmem:[%s319_s0 + $0x4] sm:$0xf] }
   0x2   :  { %v18_v3 = vld [vmem:[%s320_s1] sm:$0xff]  ;;  %228 = vmatpush3.msk.msra.mxu0 %vm26_vm0, %v21_v0  ;;  %229 = vmatprep.mubr.msk.f32.mxu0 %vm271_vm2, %v270_v1 }
   0x3   :  { %9 = vsyncpa [#allocation3], 0  ;;  %233 = vmatpush3.msk.msra.mxu1 %vm26_vm0, %v220_v2  ;;  %234 = vmatprep.mubr.msk.f32.mxu1 %vm271_vm2, %v270_v1  ;;  %v19_v4 = vld [vmem:[%s321_s2] sm:$0xff]  ;;  %v272_v5 = vmov 0   ;;  %s273_s1 = smov [#allocation2]  }
   0x4   :  { %230 = vmatmul.mubr.msk.f32.vlgmr.msra.gmra.mxu0 %vm22_vm1, %v18_v3  ;;  %235 = vmatmul.mubr.msk.f32.vlgmr.msra.gmra.mxu1 %vm22_vm1, %v18_v3  ;;  %v20_v6 = vld [vmem:[%s322_s3] sm:$0xff]  ;;  %s207_s2 = sshll.u32 %s273_s1, 4  ;;  %s208_s2 = int_to_ptr.vmem [resolvable:$true] %s207_s2 }
   0x5   :  { %243 = vset.pattern.permute.xlu0 %v272_v5  ;;  %s248_s3 = scalar_lea.vmem %s208_s2, 256  ;;  %p253_p1 = scmp.lt.s32.totalorder %s208_s2, %s208_s2 }
   0x6   :  { %102 = vperm.xlu0 %243, %v19_v4   ;;  %p249_p0 = scmp.ne.s32.totalorder %s208_s2, %s248_s3  ;;  %p254_p2 = scmp.lt.s32.totalorder %s248_s3, %s248_s3 }
   0x8   :  { %p255_p3 = por %p254_p2, %p253_p1 }
   0xa   :  { %108 = vperm.xlu0 %243, %v20_v6   ;;  %p256_p4 = pnand %p255_p3, %p249_p0 }
  0x81   :  { %v103_v7 = vpop.permute.xlu0 %102 }
  0x85   :  { %v109_v10 = vpop.permute.xlu0 %108 }
  0xc4   :  { %v96_v8 = vpop.f32.mrf.mxu0  ;;  %v189_v9 = vpop.f32.mrf.mxu1 }
  0xc5   :  { %v105_v11 = vmul.f32 %v103_v7, %v96_v8  ;;  %v193_v12 = vmul.f32 %v189_v9, %v103_v7 }
  0xc6   :  { %v231_v13 = vpop.f32.mrf.mxu0  ;;  %v236_v14 = vpop.f32.mrf.mxu1 }
  0xc7   :  { %v111_v15 = vadd.f32 %v109_v10, %v105_v11  ;;  %v194_v16 = vadd.f32 %v193_v12, %v109_v10 }
  0xc9   :  { %v113_v17 = vmul.f32 0.70710677, %v111_v15  ;;  %v196_v18 = vmul.f32 0.70710677, %v194_v16  ;;  %v112_v21 = vmul.f32 0.5, %v111_v15  ;;  %v195_v23 = vmul.f32 0.5, %v194_v16 }
  0xcb   :  { %244 = verf.f32 %v113_v17 }
  0xcc   :  { %246 = verf.f32 %v196_v18 }
  0xd8   :  { %v245_v19 = vpop.eup %244 }
  0xd9   :  { %v247_v20 = vpop.eup %246  ;;  %v115_v22 = vadd.f32 1.0, %v245_v19 }
  0xda   :  { %v198_v24 = vadd.f32 1.0, %v247_v20 }
  0xdb   :  { %v116_v25 = vmul.f32 %v115_v22, %v112_v21 }
  0xdc   :  { %v199_v26 = vmul.f32 %v198_v24, %v195_v23 }
  0xdd   :  { %117 = vst [vmem:[#allocation2] sm:$0xff] %v116_v25 }
  0xde   :  { %201 = vst [vmem:[#allocation2 + $0x8] sm:$0xff] %v199_v26 }
  0xdf   :  { %259 = shalt.err (!%p256_p4)
}
  0xe0   :  { %s274_s24 = smov 128   ;;  %s275_s25 = smov 8  }
  0xe1   :  { %213 = dma.vmem_to_hbm [thread:$0]  %s208_s2, 256, %s323_s4, [#allocation3], %s274_s24, %s274_s24, %s275_s25  }
  0xe2   :  { %268 = dma.done.wait [#allocation3], 256  }
  0xe3   :  { %269 = vsyncadd [#allocation3], 4294967040 }
  0xe4   :  { %217 = vsyncpa [#allocation3], 1 }

// kernel: conv_block_forward.2
= control target key start
LH: loop header
LB: loop body
LE: loop exit
PB: predicated region body
PF: predicated region fallthrough
CT: control target
= control target key end

     0   :  { %vm26_vm0 = vcmask 1043456   ;;  %v225_v0 = vmov 0.0   ;;  %vm22_vm1 = vcmask 31744   ;;  %vm226_vm2 = vmmov 0   ;;  %s278_s0 = inlined_call_operand.vmem [shape: f32[2,4,128], index: 0, kind: input, shape index: {}]   ;;  %s279_s1 = inlined_call_operand.vmem [shape: f32[8,4], index: 1, kind: input, shape index: {}]   ;;  %s280_s2 = inlined_call_operand.vmem [shape: f32[1,8,1], index: 2, kind: output, shape index: {0}]   ;;  %s281_s3 = inlined_call_operand.vmem [shape: f32[1,8,1], index: 3, kind: output, shape index: {1}]  }
   0x1   :  { %213 = vmatprep.subr.mxu0 %v225_v0  ;;  %218 = vmatprep.subr.mxu1 %v225_v0  ;;  %v21_v1 = vld [vmem:[%s278_s0] sm:$0xf]  ;;  %v206_v2 = vld [vmem:[%s278_s0 + $0x4] sm:$0xf]  ;;  %vm17_vm3 = vcmask 7168  }
   0x2   :  { %v20_v3 = vld [vmem:[%s279_s1] sm:$0xff]  ;;  %214 = vmatpush3.msk.msra.mxu0 %vm26_vm0, %v21_v1  ;;  %215 = vmatprep.mubr.msk.f32.mxu0 %vm226_vm2, %v225_v0  ;;  %18 = vst.msk [vmem:[%s280_s2] sm:$0xff] %vm17_vm3, %v225_v0  ;;  %19 = vst.msk [vmem:[%s281_s3] sm:$0xff] %vm17_vm3, %v225_v0 }
   0x3   :  { %219 = vmatpush3.msk.msra.mxu1 %vm26_vm0, %v206_v2  ;;  %220 = vmatprep.mubr.msk.f32.mxu1 %vm226_vm2, %v225_v0 }
   0x4   :  { %216 = vmatmul.mubr.msk.f32.vlgmr.msra.gmra.mxu0 %vm22_vm1, %v20_v3  ;;  %221 = vmatmul.mubr.msk.f32.vlgmr.msra.gmra.mxu1 %vm22_vm1, %v20_v3 }
   0x9   :  { %v189_v11 = vld [vmem:[%s280_s2] sm:$0xff] }
   0xa   :  { %v193_v16 = vld [vmem:[%s281_s3] sm:$0xff] }
  0xc4   :  { %v96_v4 = vpop.f32.mrf.mxu0  ;;  %v178_v5 = vpop.f32.mrf.mxu1 }
  0xc5   :  { %182 = vadd.xlane.f32.xlu1 %v178_v5  ;;  %100 = vadd.xlane.f32.xlu0 %v96_v4  ;;  %v185_v8 = vmul.f32 %v178_v5, %v178_v5  ;;  %v103_v9 = vmul.f32 %v96_v4, %v96_v4 }
  0xc6   :  { %v217_v6 = vpop.f32.mrf.mxu0  ;;  %v222_v7 = vpop.f32.mrf.mxu1 }
  0xc9   :  { %186 = vadd.xlane.f32.xlu1 %v185_v8  ;;  %104 = vadd.xlane.f32.xlu0 %v103_v9 }
 0x14e   :  { %v183_v10 = vpop.xlane.xlu1 %182  ;;  %v101_v12 = vpop.xlane.xlu0 %100 }
 0x14f   :  { %v184_v13 = vadd.f32 %v183_v10, %v101_v12 }
 0x151   :  { %v190_v14 = vadd.f32 %v189_v11, %v184_v13 }
 0x152   :  { %v187_v15 = vpop.xlane.xlu1 %186  ;;  %v105_v17 = vpop.xlane.xlu0 %104 }
 0x153   :  { %192 = vst.msk [vmem:[%s280_s2] sm:$0xff] %vm17_vm3, %v190_v14  ;;  %v188_v18 = vadd.f32 %v187_v15, %v105_v17 }
 0x155   :  { %v194_v19 = vadd.f32 %v193_v16, %v188_v18 }
 0x157   :  { %195 = vst.msk [vmem:[%s281_s3] sm:$0xff] %vm17_vm3, %v194_v19 }

</bundles_post_ra>
